<compile_context>
chip_gen: v5e
topology: v5e:2x2
jax: 0.10.0
libtpu: 0.0.40
codegen_flags: <defaults>
</compile_context>

<pallas_src>
import functools

import jax
import jax.numpy as jnp
from jax.experimental import pallas as pl
from jax.experimental.pallas import tpu as pltpu

_LANE = 128
_SUBLANE = 8


def attention_kernel(x_ref, w_ref, b_ref, len_ref, out_ref):
    x = x_ref[...].astype(jnp.float32)               # (TB, T, D)  upcast in VMEM
    w = w_ref[...].astype(jnp.float32)               # (1, D)
    bias = b_ref[0]                                   # f32 scalar  (SMEM)
    lengths = len_ref[...]                            # (TB, 1) int32

    TB, T, D = x.shape

    # Linear(D, 1): VPU multiply + XLU lane-reduce over D (no MXU dispatches).
    scores = jnp.sum(x * w.reshape(1, 1, D), axis=-1) + bias       # (TB, T)

    # Mask padded time steps: t >= lengths[b]  ->  -inf.
    t_idx = jax.lax.broadcasted_iota(jnp.int32, (TB, T), 1)
    scores = jnp.where(t_idx < lengths, scores, -jnp.inf)

    # Softmax over T on the dense 2-D (TB, T) layout.
    # NOTE: a fully-masked row (length == 0) yields NaN, matching PyTorch.
    m = jnp.max(scores, axis=-1, keepdims=True)                    # (TB, 1)
    e = jnp.exp(scores - m)                                        # (TB, T)
    weights = e / jnp.sum(e, axis=-1, keepdims=True)               # (TB, T)

    # Context: VPU multiply + XLU sublane-reduce over T.
    ctx = jnp.sum(x * weights[:, :, None], axis=1)                 # (TB, D)
    out_ref[...] = ctx.astype(out_ref.dtype)


def _round_up(x, m):
    return (x + m - 1) // m * m


def _cdiv(a, b):
    return -(-a // b)


def _padded_row_bytes(T, D, in_dtype_bytes, out_dtype_bytes):
    """(8,128)-padded VMEM bytes per batch row of the per-step working set."""
    T_p = _round_up(T, _SUBLANE)          # sublane padding of the time axis
    D_p = _round_up(D, _LANE)             # lane padding of the feature axis
    T_l = _round_up(T, _LANE)             # lane padding of 2-D (TB, T) temps
    return (
        2 * T_p * D_p * in_dtype_bytes    # x block (native dtype), double-buffered
        + 3 * T_p * D_p * 4               # f32 upcast + elementwise temporaries
        + 2 * D_p * out_dtype_bytes       # out block, double-buffered
        + 2 * _LANE * 4                   # (tb, 1) int32 lengths block, lane-padded
        + 6 * T_l * 4                     # 2-D softmax temporaries
    )


def _choose_block_b(B, T, D, in_dtype_bytes, out_dtype_bytes,
                    budget_bytes=20 << 20):
    """Batch tile: padding-aware VMEM budget, >= 2 (even) grid steps when possible."""
    per_row = _padded_row_bytes(T, D, in_dtype_bytes, out_dtype_bytes)
    tb = max(1, int(budget_bytes // per_row))
    if B <= _SUBLANE:
        return B                                        # single tiny step
    if tb >= B:
        # Whole batch fits the budget: still split into 2 even steps so the
        # pipeline overlaps and v7x megacore shards the grid.
        return min(B, _round_up(_cdiv(B, 2), _SUBLANE))
    tb = max(_SUBLANE, (tb // _SUBLANE) * _SUBLANE)     # (8,128) sublane rule
    nsteps = _cdiv(B, tb)
    if nsteps > 1 and nsteps % 2 == 1:                  # prefer even step count (v7x)
        tb = max(_SUBLANE, _round_up(_cdiv(B, nsteps + 1), _SUBLANE))
    return min(tb, B)


@functools.partial(jax.jit, static_argnames=("block_b",))
def attention_layer(lstm_outputs, lengths, w, b, *, block_b=None):
    """lstm_outputs: (B, T, D) float; lengths: (B,) int; w: (1, D); b: (1,)."""
    B, T, D = lstm_outputs.shape
    out_dtype = lstm_outputs.dtype
    in_bytes = jnp.dtype(lstm_outputs.dtype).itemsize
    out_bytes = jnp.dtype(out_dtype).itemsize

    w2 = w.astype(jnp.float32).reshape(1, D)
    b1 = b.astype(jnp.float32).reshape(1)
    lengths2d = jnp.asarray(lengths, dtype=jnp.int32).reshape(B, 1)

    tb = (_choose_block_b(B, T, D, in_bytes, out_bytes)
          if block_b is None else block_b)
    grid = (pl.cdiv(B, tb),)

    # Padding-aware VMEM estimate with headroom, capped for v7x's 64 MiB / TC.
    est = _padded_row_bytes(T, D, in_bytes, out_bytes) * tb + (1 << 20)
    vmem_limit = int(min(max(2 * est, 32 << 20), 48 << 20))

    return pl.pallas_call(
        attention_kernel,
        out_shape=jax.ShapeDtypeStruct((B, D), out_dtype),
        grid=grid,
        in_specs=[
            pl.BlockSpec((tb, T, D), lambda i: (i, 0, 0)),           # x (native dtype)
            pl.BlockSpec((1, D), lambda i: (0, 0)),                  # w
            pl.BlockSpec(memory_space=pltpu.MemorySpace.SMEM),       # bias scalar
            pl.BlockSpec((tb, 1), lambda i: (i, 0)),                 # lengths
        ],
        out_specs=pl.BlockSpec((tb, D), lambda i: (i, 0)),
        compiler_params=pltpu.CompilerParams(
            dimension_semantics=("parallel",),
            vmem_limit_bytes=vmem_limit,
        ),
    )(lstm_outputs, w2, b1, lengths2d)


def reference(lstm_outputs, lengths, w, b):
    """Pure-JAX (VPU-only) reference mirroring the PyTorch forward."""
    x = lstm_outputs.astype(jnp.float32)
    wf = w.astype(jnp.float32).reshape(1, 1, -1)
    scores = jnp.sum(x * wf, axis=-1) + b.astype(jnp.float32)[0]
    T = x.shape[1]
    mask = jnp.arange(T)[None, :] < lengths[:, None]
    scores = jnp.where(mask, scores, -jnp.inf)
    weights = jax.nn.softmax(scores, axis=1)
    return jnp.sum(x * weights[:, :, None], axis=1)


if __name__ == "__main__":
    key = jax.random.PRNGKey(0)
    k_x, k_w, k_b, k_x2, k_len, k_x3, k_len3 = jax.random.split(key, 7)

    # nn.Linear(input_dim=32, 1): weight (1, D), bias (1,)
    D = 32
    w = jax.random.normal(k_w, (1, D), dtype=jnp.float32) * 0.1
    b = jax.random.normal(k_b, (1,), dtype=jnp.float32) * 0.1

    # Case 1: module-spec shapes (B=2, T=8, D=32); auto tile (single step).
    B1, T1 = 2, 8
    x1 = jax.random.normal(k_x, (B1, T1, D), dtype=jnp.float32)
    len1 = jnp.array([5, 8], dtype=jnp.int32)
    out1 = jax.block_until_ready(attention_layer(x1, len1, w, b))
    ref1 = reference(x1, len1, w, b)
    assert out1.shape == (B1, D)
    assert jnp.allclose(out1, ref1, atol=1e-4, rtol=1e-4)

    # Case 2: auto tiling splits B=16 into 2 even grid steps (pipeline / megacore).
    B2, T2 = 16, 8
    x2 = jax.random.normal(k_x2, (B2, T2, D), dtype=jnp.float32)
    len2 = jax.random.randint(k_len, (B2,), 1, T2 + 1, dtype=jnp.int32)
    out2 = jax.block_until_ready(attention_layer(x2, len2, w, b))
    ref2 = reference(x2, len2, w, b)
    assert out2.shape == (B2, D)
    assert jnp.allclose(out2, ref2, atol=1e-4, rtol=1e-4)

    # Case 3: B % block_b != 0 — padded remainder rows are masked on writeback.
    B3, T3 = 13, 8
    x3 = jax.random.normal(k_x3, (B3, T3, D), dtype=jnp.float32)
    len3 = jax.random.randint(k_len3, (B3,), 1, T3 + 1, dtype=jnp.int32)
    out3 = jax.block_until_ready(attention_layer(x3, len3, w, b, block_b=8))
    ref3 = reference(x3, len3, w, b)
    assert out3.shape == (B3, D)
    assert jnp.allclose(out3, ref3, atol=1e-4, rtol=1e-4)

    # Case 4: native bf16 input stays bf16 through HBM/DMA; upcast happens in-kernel.
    x4 = x2.astype(jnp.bfloat16)
    out4 = jax.block_until_ready(attention_layer(x4, len2, w, b))
    assert out4.dtype == jnp.bfloat16
    ref4 = reference(x4, len2, w, b)   # f32 math on the same bf16-rounded inputs
    assert jnp.allclose(out4.astype(jnp.float32), ref4, atol=3e-2, rtol=3e-2)

    print("KERNEL_OK")
</pallas_src>

<mosaic_0001>
module attributes {stable_mosaic.version = 11 : i64} {
  func.func @attention_kernel(%arg0: i32, %arg1: memref<2x8x32xf32, #tpu.memory_space<vmem>>, %arg2: memref<1x32xf32, #tpu.memory_space<vmem>>, %arg3: memref<1xf32, #tpu.memory_space<smem>>, %arg4: memref<2x1xi32, #tpu.memory_space<vmem>>, %arg5: memref<2x32xf32, #tpu.memory_space<vmem>>) attributes {dimension_semantics = [#tpu.dimension_semantics<parallel>], iteration_bounds = array<i64: 1>, scalar_prefetch = 0 : i64, scratch_operands = 0 : i64, tpu.core_type = #tpu.core_type<tc>, window_params = [{transform_indices = @transform_0, window_bounds = array<i64: 2, 8, 32>}, {pipeline_mode = #tpu.pipeline_mode<synchronous>, transform_indices = @transform_1, window_bounds = array<i64: 1, 32>}, {transform_indices = @transform_2, window_bounds = array<i64: 1>}, {transform_indices = @transform_3, window_bounds = array<i64: 2, 1>}, {transform_indices = @transform_4, window_bounds = array<i64: 2, 32>}]} {
    %c0 = arith.constant 0 : index
    %c0_0 = arith.constant 0 : index
    %c0_1 = arith.constant 0 : index
    %0 = vector.load %arg1[%c0, %c0_0, %c0_1] : memref<2x8x32xf32, #tpu.memory_space<vmem>>, vector<2x8x32xf32>
    %c0_2 = arith.constant 0 : index
    %c0_3 = arith.constant 0 : index
    %1 = vector.load %arg2[%c0_2, %c0_3] : memref<1x32xf32, #tpu.memory_space<vmem>>, vector<1x32xf32>
    %c0_4 = arith.constant 0 : index
    %2 = memref.load %arg3[%c0_4] : memref<1xf32, #tpu.memory_space<smem>>
    %c0_5 = arith.constant 0 : index
    %c0_6 = arith.constant 0 : index
    %3 = vector.load %arg4[%c0_5, %c0_6] : memref<2x1xi32, #tpu.memory_space<vmem>>, vector<2x1xi32>
    %4 = vector.shape_cast %1 : vector<1x32xf32> to vector<1x1x32xf32>
    %5 = vector.broadcast %4 : vector<1x1x32xf32> to vector<2x8x32xf32>
    %6 = arith.mulf %0, %5 : vector<2x8x32xf32>
    %cst = arith.constant dense<0.000000e+00> : vector<2x8xf32>
    %7 = vector.multi_reduction <add>, %6, %cst [2] : vector<2x8x32xf32> to vector<2x8xf32>
    %8 = vector.broadcast %2 : f32 to vector<2x8xf32>
    %9 = arith.addf %7, %8 : vector<2x8xf32>
    %10 = tpu.iota {dimensions = array<i32: 1>} : vector<2x8xi32>
    %11 = vector.broadcast %3 : vector<2x1xi32> to vector<2x8xi32>
    %12 = arith.cmpi slt, %10, %11 : vector<2x8xi32>
    %cst_7 = arith.constant 0xFF800000 : f32
    %13 = vector.broadcast %cst_7 : f32 to vector<2x8xf32>
    %14 = arith.select %12, %9, %13 : vector<2x8xi1>, vector<2x8xf32>
    %cst_8 = arith.constant dense<0xFF800000> : vector<2xf32>
    %15 = vector.multi_reduction <maximumf>, %14, %cst_8 [1] : vector<2x8xf32> to vector<2xf32>
    %16 = vector.shape_cast %15 : vector<2xf32> to vector<2x1xf32>
    %17 = vector.broadcast %16 : vector<2x1xf32> to vector<2x8xf32>
    %18 = arith.subf %14, %17 : vector<2x8xf32>
    %19 = math.exp %18 : vector<2x8xf32>
    %cst_9 = arith.constant dense<0.000000e+00> : vector<2xf32>
    %20 = vector.multi_reduction <add>, %19, %cst_9 [1] : vector<2x8xf32> to vector<2xf32>
    %21 = vector.shape_cast %20 : vector<2xf32> to vector<2x1xf32>
    %22 = vector.broadcast %21 : vector<2x1xf32> to vector<2x8xf32>
    %23 = arith.divf %19, %22 : vector<2x8xf32>
    %24 = vector.shape_cast %23 : vector<2x8xf32> to vector<2x8x1xf32>
    %25 = vector.broadcast %24 : vector<2x8x1xf32> to vector<2x8x32xf32>
    %26 = arith.mulf %0, %25 : vector<2x8x32xf32>
    %cst_10 = arith.constant dense<0.000000e+00> : vector<2x32xf32>
    %27 = vector.multi_reduction <add>, %26, %cst_10 [1] : vector<2x8x32xf32> to vector<2x32xf32>
    %c0_11 = arith.constant 0 : index
    %c0_12 = arith.constant 0 : index
    %28 = vector.load %arg5[%c0_11, %c0_12] : memref<2x32xf32, #tpu.memory_space<vmem>>, vector<2x32xf32>
    tpu.vector_store %arg5[%c0_11, %c0_12], %27 {strides = array<i32>} : memref<2x32xf32, #tpu.memory_space<vmem>>, vector<2x32xf32>,
    return
  }
  func.func @transform_0(%arg0: i32) -> (i32, i32, i32) {
    %c0_i32 = arith.constant 0 : i32
    %c0_i32_0 = arith.constant 0 : i32
    %c0_i32_1 = arith.constant 0 : i32
    return %arg0, %c0_i32, %c0_i32_0 : i32, i32, i32
  }
  func.func @transform_1(%arg0: i32) -> (i32, i32) {
    %c0_i32 = arith.constant 0 : i32
    %c0_i32_0 = arith.constant 0 : i32
    %c0_i32_1 = arith.constant 0 : i32
    return %c0_i32, %c0_i32_0 : i32, i32
  }
  func.func @transform_2(%arg0: i32) -> i32 {
    %c0_i32 = arith.constant 0 : i32
    %c0_i32_0 = arith.constant 0 : i32
    return %c0_i32 : i32
  }
  func.func @transform_3(%arg0: i32) -> (i32, i32) {
    %c0_i32 = arith.constant 0 : i32
    %c0_i32_0 = arith.constant 0 : i32
    return %arg0, %c0_i32 : i32, i32
  }
  func.func @transform_4(%arg0: i32) -> (i32, i32) {
    %c0_i32 = arith.constant 0 : i32
    %c0_i32_0 = arith.constant 0 : i32
    return %arg0, %c0_i32 : i32, i32
  }
}

</mosaic_0001>

<bundles_post_ra>
// kernel: attention_layer.1
= control target key start
LH: loop header
LB: loop body
LE: loop exit
PB: predicated region body
PF: predicated region fallthrough
CT: control target
= control target key end

     0   :  { %10 = vsyncpa [#allocation4], 0  ;;  %s263_s0 = inlined_call_operand.hbm [shape: f32[2,8,32], index: 0, kind: input, shape index: {}]   ;;  %s264_s1 = inlined_call_operand.vmem [shape: f32[1,32], index: 1, kind: input, shape index: {}]   ;;  %s265_s2 = inlined_call_operand.<no memory space> [shape: f32[1], index: 2, kind: input, shape index: {}]   ;;  %s266_s3 = inlined_call_operand.vmem [shape: s32[2,1], index: 3, kind: input, shape index: {}]   ;;  %s267_s4 = inlined_call_operand.hbm [shape: f32[2,32], index: 4, kind: output, shape index: {}]  }
   0x1   :  { %11 = vsyncpa [#allocation5], 0  ;;  %s16_s17 = sshll.u32 %s263_s0, 4  ;;  %s212_s18 = smov [#allocation3]   ;;  %s17_s17 = int_to_ptr.hbm [resolvable:$true] %s16_s17 }
   0x2   :  { %s18_s19 = sshll.u32 %s212_s18, 4  ;;  %s213_s20 = smov 128   ;;  %s19_s19 = int_to_ptr.vmem [resolvable:$true] %s18_s19 }
   0x3   :  { %s214_s21 = smov 8  }
   0x4   :  { %24 = dma.hbm_to_vmem [thread:$0]  %s17_s17, 256, %s19_s19, [#allocation4], %s213_s20, %s213_s20, %s214_s21  }
   0x5   :  { %208 = dma.done.wait [#allocation4], 256  }
   0x6   :  { %209 = vsyncadd [#allocation4], 4294967040  ;;  %v215_v0 = vmov 0   ;;  %v35_v1 = vld [vmem:[#allocation3] sm:$0xff]  ;;  %vm45_vm0 = vcmask 261120   ;;  %v36_v5 = vld [vmem:[#allocation3 + $0x8] sm:$0xff]  ;;  %v55_v10 = vlaneseq  ;;  %v52_v11 = vstv %s265_s2 }
   0x7   :  { %152 = vset.pattern.permute.xlu1 %v215_v0  ;;  %v155_v2 = vld [vmem:[%s264_s1] ss:$0 sm:$0xff]  ;;  %vm65_vm1 = vcmask 1041409   ;;  %vm69_vm3 = vcmask 58368   ;;  %s216_s1 = smov [#allocation6]   ;;  %s137_s28 = sshll.u32 %s267_s4, 4  ;;  %s138_s28 = int_to_ptr.hbm [resolvable:$true] %s137_s28 }
   0x8   :  { %v39_v3 = vld [vmem:[%s266_s3] sm:$0x3]  ;;  %v43_v4 = vmul.f32 %v155_v2, %v35_v1  ;;  %v44_v7 = vmul.f32 %v155_v2, %v36_v5  ;;  %v56_v12 = vand.u32 127, %v55_v10  ;;  %v96_v27 = vshrl.u32 %v55_v10, 7  ;;  %s135_s2 = sshll.u32 %s216_s1, 4  ;;  %s136_s2 = int_to_ptr.vmem [resolvable:$true] %s135_s2 }
   0x9   :  { %58 = vperm.xlu1 %152, %v39_v3   ;;  %vm128_vm8 = vcmask 254976  }
   0xa   :  { %v46_v6 = vsel %vm45_vm0, %v43_v4, 0.0  ;;  %v49_v8 = vsel %vm45_vm0, %v44_v7, 0.0  ;;  %154 = vset.pattern.permute.xlu0 %v96_v27  ;;  %153 = vset.pattern.permute.xlu2 %v96_v27 }
   0xb   :  { %47 = vadd.xlane.f32.xlu0 %v46_v6 }
  0x13   :  { %50 = vadd.xlane.f32.xlu0 %v49_v8 }
  0x7b   :  { %v59_v15 = vpop.permute.xlu1 %58 }
  0x7c   :  { %vm60_vm2 = vcmp.lt.s32.totalorder %v56_v12, %v59_v15 }
  0x7e   :  { %v48_v9 = vpop.xlane.xlu0 %47 }
  0x7f   :  { %v53_v13 = vadd.f32 %v52_v11, %v48_v9 }
  0x81   :  { %v63_v17 = vperm.slane %v53_v13, %v56_v12 }
  0x86   :  { %v51_v14 = vpop.xlane.xlu0 %50 }
  0x87   :  { %v54_v16 = vadd.f32 %v52_v11, %v51_v14 }
  0x89   :  { %v64_v18 = vperm.slane %v54_v16, %v56_v12 }
  0x8b   :  { %v66_v19 = vsel %vm65_vm1, %v64_v18, %v63_v17 }
  0x8c   :  { %v68_v20 = vsel %vm60_vm2, %v66_v19, -inf }
  0x8d   :  { %v70_v21 = vsel %vm69_vm3, %v68_v20, -inf }
  0x8e   :  { %71 = vmax.xlane.f32.xlu1 %v70_v21 }
 0x101   :  { %v72_v22 = vpop.xlane.xlu1 %71 }
 0x102   :  { %v73_v23 = vsub.f32 %v68_v20, %v72_v22 }
 0x104   :  { %v74_v24 = vmul.f32 1.442695, %v73_v23 }
 0x106   :  { %156 = vpow2.f32 %v74_v24 }
 0x10c   :  { %v157_v25 = vpop.eup %156 }
 0x10d   :  { %v76_v26 = vsel %vm69_vm3, %v157_v25, 0.0 }
 0x10e   :  { %77 = vadd.xlane.f32.xlu2 %v76_v26 }
 0x181   :  { %v78_v28 = vpop.xlane.xlu2 %77 }
 0x182   :  { %158 = vrcp.f32 %v78_v28  ;;  %v90_v32 = vand.u32 2147483648, %v78_v28  ;;  %v88_v34 = vand.u32 2147483647, %v78_v28  ;;  %vm84_vm5 = vweird.f32 %v78_v28 }
 0x184   :  { %v91_v36 = vor.u32 1.1754944e-38, %v90_v32  ;;  %vm89_vm7 = vcmp.eq.f32.partialorder %v88_v34, 8.507059e+37 }
 0x188   :  { %v159_v29 = vpop.eup %158 }
 0x189   :  { %v80_v30 = vmul.f32 %v159_v29, %v78_v28  ;;  %vm85_vm4 = vweird.f32 %v159_v29 }
 0x18a   :  { %vm86_vm6 = vmor %vm84_vm5, %vm85_vm4 }
 0x18b   :  { %v81_v31 = vsub.f32 1.0, %v80_v30 }
 0x18d   :  { %v82_v33 = vmul.f32 %v159_v29, %v81_v31 }
 0x18f   :  { %v83_v35 = vadd.f32 %v159_v29, %v82_v33 }
 0x191   :  { %v87_v37 = vsel %vm86_vm6, %v159_v29, %v83_v35 }
 0x192   :  { %v92_v38 = vsel %vm89_vm7, %v91_v36, %v87_v37 }
 0x193   :  { %v93_v39 = vmul.f32 %v157_v25, %v92_v38 }
 0x195   :  { %v101_v40 = vperm.slane %v93_v39, 1  ;;  %v94_v41 = vperm.slane %v93_v39, 0 }
 0x197   :  { %106 = vperm.xlu0 %154, %v101_v40   ;;  %99 = vperm.xlu2 %153, %v94_v41  }
 0x1f1   :  { %v100_v42 = vpop.permute.xlu2 %99 }
 0x1f2   :  { %v108_v43 = vmul.f32 %v100_v42, %v35_v1 }
 0x1f4   :  { %v110_v44 = vsel %vm45_vm0, %v108_v43, 0.0 }
 0x1f5   :  { %v111_v45 = vrot.slane %v110_v44, 4 }
 0x1f7   :  { %v112_v46 = vadd.f32 %v111_v45, %v110_v44 }
 0x1f9   :  { %v113_v49 = vrot.slane %v112_v46, 2 }
 0x1fb   :  { %v114_v52 = vadd.f32 %v113_v49, %v112_v46 }
 0x1fd   :  { %v115_v55 = vrot.slane %v114_v52, 1 }
 0x1ff   :  { %v116_v58 = vadd.f32 %v115_v55, %v114_v52 }
 0x209   :  { %v107_v47 = vpop.permute.xlu0 %106 }
 0x20a   :  { %v109_v48 = vmul.f32 %v107_v47, %v36_v5 }
 0x20c   :  { %v117_v50 = vsel %vm45_vm0, %v109_v48, 0.0 }
 0x20d   :  { %v118_v51 = vrot.slane %v117_v50, 4 }
 0x20f   :  { %v119_v53 = vadd.f32 %v118_v51, %v117_v50 }
 0x211   :  { %v120_v54 = vrot.slane %v119_v53, 2 }
 0x213   :  { %v121_v56 = vadd.f32 %v120_v54, %v119_v53 }
 0x215   :  { %v122_v57 = vrot.slane %v121_v56, 1 }
 0x217   :  { %v123_v59 = vadd.f32 %v122_v57, %v121_v56 }
 0x219   :  { %v126_v60 = vsel %vm65_vm1, %v123_v59, %v116_v58 }
 0x21a   :  { %129 = vst.msk [vmem:[#allocation6] sm:$0x3] %vm128_vm8, %v126_v60 }
 0x21b   :  { %140 = dma.vmem_to_hbm [thread:$0]  %s136_s2, 32, %s138_s28, [#allocation5]  }
 0x21c   :  { %210 = dma.done.wait [#allocation5], 32  }
 0x21d   :  { %211 = vsyncadd [#allocation5], 4294967264 }
 0x21e   :  { %145 = vsyncpa [#allocation4], 1 }
 0x21f   :  { %146 = vsyncpa [#allocation5], 1 }

</bundles_post_ra>
